<compile_context>
chip_gen: v6e
topology: v6e:2x2x1
jax: 0.10.0
libtpu: 0.0.40
codegen_flags: <defaults>
</compile_context>

<pallas_src>
import jax
import jax.numpy as jnp
from jax import lax
from jax.experimental import pallas as pl
from jax.experimental.pallas import tpu as pltpu


def _cdiv(a: int, b: int) -> int:
    return (a + b - 1) // b


def _round_up(x: int, m: int) -> int:
    return _cdiv(x, m) * m


_F32_MIN = float(jnp.finfo(jnp.float32).min)


def _make_kernel(*, n_class: int, n_rows: int, tile_rows: int, class_chunk: int,
                 num_class_chunks: int, epsilon: float, compute_dtype):
    # Smoothed-label weights. sum_c w_c == (1-eps) + (C-1)*eps/(C-1) == 1
    # exactly, which is what allows the fused form loss = lse(x) - sum(w*x).
    coef_t = float(1.0 - epsilon)
    coef_o = float(epsilon) / float(n_class - 1)
    cd = compute_dtype
    mask_val = float(jnp.finfo(cd).min)   # "-inf" substitute; avoids inf-inf NaNs
    ragged_cols = (n_class % class_chunk) != 0
    ragged_rows = (n_rows % tile_rows) != 0

    def kernel(logits_ref, tgt_ref, part_ref, m_ref, s_ref, wx_ref):
        k = pl.program_id(1)

        @pl.when(k == 0)
        def _init():
            m_ref[...] = jnp.full_like(m_ref, _F32_MIN)
            s_ref[...] = jnp.zeros_like(s_ref)
            wx_ref[...] = jnp.zeros_like(wx_ref)

        x = logits_ref[...]
        if x.dtype != cd:
            x = x.astype(cd)                     # f32 path (v5e / f32 inputs)
        t = tgt_ref[...]                         # (TB, 1) int32
        TB, CK = x.shape

        cls = k * class_chunk + lax.broadcasted_iota(jnp.int32, (TB, CK), 1)

        if ragged_cols:
            col_ok = cls < n_class
            xm = jnp.where(col_ok, x, jnp.asarray(mask_val, dtype=cd))
        else:
            xm = x

        # --- online logsumexp: running max / rescaled sum-exp, f32 state ---
        m_prev = m_ref[...]
        m_new = jnp.maximum(
            m_prev, jnp.max(xm, axis=1, keepdims=True).astype(jnp.float32))
        e = jnp.exp(xm - m_new.astype(cd))       # masked cols underflow to 0
        s_ref[...] = (s_ref[...] * jnp.exp(m_prev - m_new)
                      + jnp.sum(e, axis=1, keepdims=True, dtype=jnp.float32))
        m_ref[...] = m_new

        # --- fused smoothed-label weighted sum of raw logits (f32 accum) ---
        w = jnp.where(cls == t, jnp.asarray(coef_t, dtype=cd),
                      jnp.asarray(coef_o, dtype=cd))
        xw = x * w
        if ragged_cols:
            xw = jnp.where(col_ok, xw, jnp.asarray(0.0, dtype=cd))
        wx_ref[...] += jnp.sum(xw, axis=1, keepdims=True, dtype=jnp.float32)

        @pl.when(k == num_class_chunks - 1)
        def _finalize():
            per_row = m_ref[...] + jnp.log(s_ref[...]) - wx_ref[...]   # (TB,1) f32
            if ragged_rows:                      # mask rows past the real batch
                rows = (pl.program_id(0) * tile_rows
                        + lax.broadcasted_iota(jnp.int32, (TB, 1), 0))
                per_row = jnp.where(rows < n_rows, per_row, 0.0)
            # Lane-dense per-tile partial sum (unmasked vector stores).
            part_ref[...] = jnp.broadcast_to(jnp.sum(per_row), (8, 128))

    return kernel


def label_smoothing_loss(outputs: jax.Array, targets: jax.Array,
                         epsilon: float = 0.1) -> jax.Array:
    """outputs: (B, C) float logits (any dtype); targets: (B,) int. Scalar f32."""
    B, C = outputs.shape
    if C < 2:
        raise ValueError("LabelSmoothingLoss needs at least 2 classes.")
    in_dt = jnp.dtype(outputs.dtype)
    in_isz = in_dt.itemsize
    sub = max(8, 32 // in_isz)     # sublane tile: 8 (f32) / 16 (bf16) / 32 (int8)

    try:
        kind = jax.devices()[0].device_kind.lower()
    except Exception:
        kind = ""
    is_v5e = ("v5e" in kind) or ("v5 lite" in kind) or ("v5lite" in kind)

    # bf16 elementwise pipeline on v6e/v7x (f32 accumulation); v5e has no bf16
    # VALU/EUP so it keeps the f32 compute path.
    cd = jnp.float32
    if in_dt == jnp.bfloat16 and (("v6" in kind) or ("v7" in kind)):
        cd = jnp.bfloat16
    cd_isz = jnp.dtype(cd).itemsize

    # Per-generation VMEM target (v7x: 64 MiB physical; v5e/v6e: 128 MiB).
    try:
        vmem_cap = int(pltpu.get_tpu_info().vmem_capacity_bytes)
    except Exception:
        vmem_cap = 64 * 1024 * 1024                 # assume the tightest (v7x)
    vmem_limit = min(vmem_cap * 5 // 8, 96 * 1024 * 1024)   # ~40 MiB on v7x
    budget = int(vmem_limit * 0.7)                  # working-set budget

    n_buf = 3 if is_v5e else 2                      # logits pipeline depth

    def per_row_bytes(ck: int) -> int:
        blocks = n_buf * ck * in_isz                # pipelined logits block(s)
        temps = ck * (4 * cd_isz + 4)               # live elementwise temps + i32 iota
        lane_padded = 3 * 512 + 2 * 512             # (tb,1) scratches + tgt blocks
        return blocks + temps + lane_padded

    # Class chunking: single pass when a >=256-row tile still fits in the
    # budget; otherwise walk 2048-wide class chunks with online accumulators.
    CC = 2048
    if C <= CC or budget // per_row_bytes(C) >= 256:
        cc = C
    else:
        cc = CC
    nck = _cdiv(C, cc)

    tb = budget // per_row_bytes(cc)
    tb = max(sub, min(4096, (tb // sub) * sub))
    tb = min(tb, _round_up(B, sub))                 # never taller than the batch
    if B >= 2 * sub:                                # >=2 row tiles -> both v7x cores fed
        tb = min(tb, _round_up(_cdiv(B, 2), sub))
    tb = max(sub, (tb // sub) * sub)
    n_rt = _cdiv(B, tb)

    tgt = targets.astype(jnp.int32).reshape(B, 1)   # tiny; no logits padding copy

    logits_spec_kwargs = {}
    if is_v5e:
        logits_spec_kwargs["pipeline_mode"] = pl.Buffered(3)

    kernel = _make_kernel(n_class=C, n_rows=B, tile_rows=tb, class_chunk=cc,
                          num_class_chunks=nck, epsilon=epsilon, compute_dtype=cd)

    parts = pl.pallas_call(
        kernel,
        out_shape=jax.ShapeDtypeStruct((n_rt * 8, 128), jnp.float32),
        grid=(n_rt, nck),
        in_specs=[
            pl.BlockSpec((tb, cc), lambda i, k: (i, k), **logits_spec_kwargs),
            pl.BlockSpec((tb, 1), lambda i, k: (i, 0)),
        ],
        out_specs=pl.BlockSpec((8, 128), lambda i, k: (i, 0)),
        scratch_shapes=[pltpu.VMEM((tb, 1), jnp.float32),   # running max
                        pltpu.VMEM((tb, 1), jnp.float32),   # running sum-exp
                        pltpu.VMEM((tb, 1), jnp.float32)],  # running weighted sum
        compiler_params=pltpu.CompilerParams(
            dimension_semantics=("parallel", "arbitrary"),
            vmem_limit_bytes=int(vmem_limit)),
    )(outputs, tgt)

    # One partial per row tile; mean over batch via a multiply, not a divide.
    tile_sums = parts.reshape(n_rt, 8, 128)[:, 0, 0]
    return jnp.sum(tile_sums) * (1.0 / B)


if __name__ == "__main__":
    key = jax.random.PRNGKey(0)
    k1, k2 = jax.random.split(key)

    B, C = 8, 32  # small synthetic logits / integer class targets
    outputs = jax.random.normal(k1, (B, C), dtype=jnp.float32)
    targets = jax.random.randint(k2, (B,), 0, C, dtype=jnp.int32)

    loss = label_smoothing_loss(outputs, targets, epsilon=0.1)
    jax.block_until_ready(loss)

    # Pure-JAX reference (same math as the PyTorch module).
    eps = 0.1
    one_hot = jax.nn.one_hot(targets, C, dtype=jnp.float32)
    smooth = one_hot * (1 - eps) + (1 - one_hot) * eps / (C - 1)
    log_probs = jax.nn.log_softmax(outputs, axis=1)
    ref = jnp.mean(-jnp.sum(smooth * log_probs, axis=1))
    assert jnp.allclose(loss, ref, atol=1e-5, rtol=1e-4), (loss, ref)

    print("KERNEL_OK")
</pallas_src>

<mosaic_0001>
module attributes {stable_mosaic.version = 11 : i64} {
  func.func @kernel(%arg0: i32, %arg1: i32, %arg2: memref<8x32xf32, #tpu.memory_space<vmem>>, %arg3: memref<8x1xi32, #tpu.memory_space<vmem>>, %arg4: memref<8x128xf32, #tpu.memory_space<vmem>>, %arg5: memref<8x1xf32, #tpu.memory_space<vmem>>, %arg6: memref<8x1xf32, #tpu.memory_space<vmem>>, %arg7: memref<8x1xf32, #tpu.memory_space<vmem>>) attributes {dimension_semantics = [#tpu.dimension_semantics<parallel>, #tpu.dimension_semantics<arbitrary>], iteration_bounds = array<i64: 1, 1>, scalar_prefetch = 0 : i64, scratch_operands = 3 : i64, tpu.core_type = #tpu.core_type<tc>, window_params = [{transform_indices = @transform_0, window_bounds = array<i64: 8, 32>}, {transform_indices = @transform_1, window_bounds = array<i64: 8, 1>}, {transform_indices = @transform_2, window_bounds = array<i64: 8, 128>}]} {
    %c0_i32 = arith.constant 0 : i32
    %0 = arith.cmpi eq, %arg1, %c0_i32 : i32
    %1 = arith.extui %0 : i1 to i32
    %c0_i32_0 = arith.constant 0 : i32
    %2 = arith.cmpi ne, %1, %c0_i32_0 : i32
    scf.if %2 {
      %cst_22 = arith.constant -3.40282347E+38 : f32
      %39 = vector.broadcast %cst_22 : f32 to vector<8x1xf32>
      %c0_23 = arith.constant 0 : index
      %c0_24 = arith.constant 0 : index
      %40 = vector.load %arg5[%c0_23, %c0_24] : memref<8x1xf32, #tpu.memory_space<vmem>>, vector<8x1xf32>
      tpu.vector_store %arg5[%c0_23, %c0_24], %39 {strides = array<i32>} : memref<8x1xf32, #tpu.memory_space<vmem>>, vector<8x1xf32>,
      %cst_25 = arith.constant 0.000000e+00 : f32
      %41 = vector.broadcast %cst_25 : f32 to vector<8x1xf32>
      %c0_26 = arith.constant 0 : index
      %c0_27 = arith.constant 0 : index
      %42 = vector.load %arg6[%c0_26, %c0_27] : memref<8x1xf32, #tpu.memory_space<vmem>>, vector<8x1xf32>
      tpu.vector_store %arg6[%c0_26, %c0_27], %41 {strides = array<i32>} : memref<8x1xf32, #tpu.memory_space<vmem>>, vector<8x1xf32>,
      %cst_28 = arith.constant 0.000000e+00 : f32
      %43 = vector.broadcast %cst_28 : f32 to vector<8x1xf32>
      %c0_29 = arith.constant 0 : index
      %c0_30 = arith.constant 0 : index
      %44 = vector.load %arg7[%c0_29, %c0_30] : memref<8x1xf32, #tpu.memory_space<vmem>>, vector<8x1xf32>
      tpu.vector_store %arg7[%c0_29, %c0_30], %43 {strides = array<i32>} : memref<8x1xf32, #tpu.memory_space<vmem>>, vector<8x1xf32>,
    } else {
    }
    %c0 = arith.constant 0 : index
    %c0_1 = arith.constant 0 : index
    %3 = vector.load %arg2[%c0, %c0_1] : memref<8x32xf32, #tpu.memory_space<vmem>>, vector<8x32xf32>
    %c0_2 = arith.constant 0 : index
    %c0_3 = arith.constant 0 : index
    %4 = vector.load %arg3[%c0_2, %c0_3] : memref<8x1xi32, #tpu.memory_space<vmem>>, vector<8x1xi32>
    %c32_i32 = arith.constant 32 : i32
    %5 = arith.muli %arg1, %c32_i32 : i32
    %6 = tpu.iota {dimensions = array<i32: 1>} : vector<8x32xi32>
    %7 = vector.broadcast %5 : i32 to vector<8x32xi32>
    %8 = arith.addi %7, %6 : vector<8x32xi32>
    %c0_4 = arith.constant 0 : index
    %c0_5 = arith.constant 0 : index
    %9 = vector.load %arg5[%c0_4, %c0_5] : memref<8x1xf32, #tpu.memory_space<vmem>>, vector<8x1xf32>
    %cst = arith.constant dense<0xFF800000> : vector<8xf32>
    %10 = vector.multi_reduction <maximumf>, %3, %cst [1] : vector<8x32xf32> to vector<8xf32>
    %11 = vector.shape_cast %10 : vector<8xf32> to vector<8x1xf32>
    %12 = arith.maximumf %9, %11 : vector<8x1xf32>
    %13 = vector.broadcast %12 : vector<8x1xf32> to vector<8x32xf32>
    %14 = arith.subf %3, %13 : vector<8x32xf32>
    %15 = math.exp %14 : vector<8x32xf32>
    %c0_6 = arith.constant 0 : index
    %c0_7 = arith.constant 0 : index
    %16 = vector.load %arg6[%c0_6, %c0_7] : memref<8x1xf32, #tpu.memory_space<vmem>>, vector<8x1xf32>
    %17 = arith.subf %9, %12 : vector<8x1xf32>
    %18 = math.exp %17 : vector<8x1xf32>
    %19 = arith.mulf %16, %18 : vector<8x1xf32>
    %cst_8 = arith.constant dense<0.000000e+00> : vector<8xf32>
    %20 = vector.multi_reduction <add>, %15, %cst_8 [1] : vector<8x32xf32> to vector<8xf32>
    %21 = vector.shape_cast %20 : vector<8xf32> to vector<8x1xf32>
    %22 = arith.addf %19, %21 : vector<8x1xf32>
    %c0_9 = arith.constant 0 : index
    %c0_10 = arith.constant 0 : index
    %23 = vector.load %arg6[%c0_9, %c0_10] : memref<8x1xf32, #tpu.memory_space<vmem>>, vector<8x1xf32>
    tpu.vector_store %arg6[%c0_9, %c0_10], %22 {strides = array<i32>} : memref<8x1xf32, #tpu.memory_space<vmem>>, vector<8x1xf32>,
    %c0_11 = arith.constant 0 : index
    %c0_12 = arith.constant 0 : index
    %24 = vector.load %arg5[%c0_11, %c0_12] : memref<8x1xf32, #tpu.memory_space<vmem>>, vector<8x1xf32>
    tpu.vector_store %arg5[%c0_11, %c0_12], %12 {strides = array<i32>} : memref<8x1xf32, #tpu.memory_space<vmem>>, vector<8x1xf32>,
    %25 = vector.broadcast %4 : vector<8x1xi32> to vector<8x32xi32>
    %26 = arith.cmpi eq, %8, %25 : vector<8x32xi32>
    %cst_13 = arith.constant 0.899999976 : f32
    %cst_14 = arith.constant 0.0032258064 : f32
    %27 = vector.broadcast %cst_13 : f32 to vector<8x32xf32>
    %28 = vector.broadcast %cst_14 : f32 to vector<8x32xf32>
    %29 = arith.select %26, %27, %28 : vector<8x32xi1>, vector<8x32xf32>
    %30 = arith.mulf %3, %29 : vector<8x32xf32>
    %c0_15 = arith.constant 0 : index
    %c0_16 = arith.constant 0 : index
    %31 = vector.load %arg7[%c0_15, %c0_16] : memref<8x1xf32, #tpu.memory_space<vmem>>, vector<8x1xf32>
    %cst_17 = arith.constant dense<0.000000e+00> : vector<8xf32>
    %32 = vector.multi_reduction <add>, %30, %cst_17 [1] : vector<8x32xf32> to vector<8xf32>
    %33 = vector.shape_cast %32 : vector<8xf32> to vector<8x1xf32>
    %34 = arith.addf %31, %33 : vector<8x1xf32>
    %c0_18 = arith.constant 0 : index
    %c0_19 = arith.constant 0 : index
    %35 = vector.load %arg7[%c0_18, %c0_19] : memref<8x1xf32, #tpu.memory_space<vmem>>, vector<8x1xf32>
    tpu.vector_store %arg7[%c0_18, %c0_19], %34 {strides = array<i32>} : memref<8x1xf32, #tpu.memory_space<vmem>>, vector<8x1xf32>,
    %c0_i32_20 = arith.constant 0 : i32
    %36 = arith.cmpi eq, %arg1, %c0_i32_20 : i32
    %37 = arith.extui %36 : i1 to i32
    %c0_i32_21 = arith.constant 0 : i32
    %38 = arith.cmpi ne, %37, %c0_i32_21 : i32
    scf.if %38 {
      %c0_22 = arith.constant 0 : index
      %c0_23 = arith.constant 0 : index
      %39 = vector.load %arg5[%c0_22, %c0_23] : memref<8x1xf32, #tpu.memory_space<vmem>>, vector<8x1xf32>
      %c0_24 = arith.constant 0 : index
      %c0_25 = arith.constant 0 : index
      %40 = vector.load %arg6[%c0_24, %c0_25] : memref<8x1xf32, #tpu.memory_space<vmem>>, vector<8x1xf32>
      %41 = math.log %40 : vector<8x1xf32>
      %42 = arith.addf %39, %41 : vector<8x1xf32>
      %c0_26 = arith.constant 0 : index
      %c0_27 = arith.constant 0 : index
      %43 = vector.load %arg7[%c0_26, %c0_27] : memref<8x1xf32, #tpu.memory_space<vmem>>, vector<8x1xf32>
      %44 = arith.subf %42, %43 : vector<8x1xf32>
      %45 = vector.shape_cast %44 : vector<8x1xf32> to vector<1x8x1xf32>
      %cst_28 = arith.constant dense<0.000000e+00> : vector<1xf32>
      %46 = vector.multi_reduction <add>, %45, %cst_28 [1, 2] : vector<1x8x1xf32> to vector<1xf32>
      %47 = vector.shape_cast %46 : vector<1xf32> to vector<1x1x1xf32>
      %48 = vector.extract %47[0, 0, 0] : f32 from vector<1x1x1xf32>
      %49 = vector.broadcast %48 : f32 to vector<8x128xf32>
      %c0_29 = arith.constant 0 : index
      %c0_30 = arith.constant 0 : index
      %50 = vector.load %arg4[%c0_29, %c0_30] : memref<8x128xf32, #tpu.memory_space<vmem>>, vector<8x128xf32>
      tpu.vector_store %arg4[%c0_29, %c0_30], %49 {strides = array<i32>} : memref<8x128xf32, #tpu.memory_space<vmem>>, vector<8x128xf32>,
    } else {
    }
    return
  }
  func.func @transform_0(%arg0: i32, %arg1: i32) -> (i32, i32) {
    %c0_i32 = arith.constant 0 : i32
    return %arg0, %arg1 : i32, i32
  }
  func.func @transform_1(%arg0: i32, %arg1: i32) -> (i32, i32) {
    %c0_i32 = arith.constant 0 : i32
    %c0_i32_0 = arith.constant 0 : i32
    return %arg0, %c0_i32 : i32, i32
  }
  func.func @transform_2(%arg0: i32, %arg1: i32) -> (i32, i32) {
    %c0_i32 = arith.constant 0 : i32
    %c0_i32_0 = arith.constant 0 : i32
    return %arg0, %c0_i32 : i32, i32
  }
}

</mosaic_0001>

<bundles_post_ra>
// kernel: tpu_custom_call.1
= control target key start
LH: loop header
LB: loop body
LE: loop exit
PB: predicated region body
PF: predicated region fallthrough
CT: control target
= control target key end

     0   :  { %vm28_vm0 = vcmask 261120   ;;  %s177_s0 = inlined_call_operand.vmem [shape: f32[8,32], index: 0, kind: input, shape index: {}]   ;;  %s178_s1 = inlined_call_operand.vmem [shape: s32[8,1], index: 1, kind: input, shape index: {}]   ;;  %s179_s2 = inlined_call_operand.hbm [shape: f32[8,128], index: 2, kind: output, shape index: {}]  }
   0x1   :  { %v20_v0 = vld [vmem:[%s177_s0] sm:$0xff] }
   0x2   :  { %7 = vsyncpa [#allocation6], 0  ;;  %v29_v1 = vsel %vm28_vm0, %v20_v0, -inf  ;;  %vm16_vm1 = vcmask 7168   ;;  %v138_v2 = vmov -3.4028235e+38   ;;  %v23_v13 = vlaneseq }
   0x3   :  { %30 = vmax.xlane.f32.xlu0 %v29_v1  ;;  %17 = vst.msk [vmem:[#allocation2] sm:$0xff] %vm16_vm1, %v138_v2  ;;  %v139_v3 = vmov 0   ;;  %v21_v4 = vld [vmem:[%s178_s1] sm:$0xff]  ;;  %v140_v5 = vmov 0.0   ;;  %v141_v16 = vmov 0.0032258064  }
   0x4   :  { %108 = vset.pattern.permute.xlu0 %v139_v3  ;;  %109 = vset.pattern.permute.xlu1 %v139_v3  ;;  %18 = vst.msk [vmem:[#allocation3] sm:$0xff] %vm16_vm1, %v140_v5  ;;  %19 = vst.msk [vmem:[#allocation4] sm:$0xff] %vm16_vm1, %v140_v5  ;;  %v24_v14 = vand.u32 127, %v23_v13  ;;  %s142_s0 = smov [#allocation5]  }
   0x5   :  { %54 = vperm.xlu1 %109, %v21_v4   ;;  %s93_s1 = sshll.u32 %s142_s0, 4  ;;  %s94_s1 = int_to_ptr.vmem [resolvable:$true] %s93_s1 }
   0x6   :  { %s116_s14 = scalar_lea.vmem %s94_s1, 128  ;;  %p121_p1 = scmp.lt.s32.totalorder %s94_s1, %s94_s1 }
   0x7   :  { %p117_p0 = scmp.ne.s32.totalorder %s94_s1, %s116_s14  ;;  %p122_p2 = scmp.lt.s32.totalorder %s116_s14, %s116_s14 }
   0x9   :  { %p123_p3 = por %p122_p2, %p121_p1 }
   0xa   :  { %v27_v6 = vld [vmem:[#allocation2] sm:$0xff] }
   0xb   :  { %v41_v24 = vld [vmem:[#allocation3] sm:$0xff]  ;;  %v59_v28 = vld [vmem:[#allocation4] sm:$0xff]  ;;  %p124_p4 = pnand %p123_p3, %p117_p0 }
  0x80   :  { %v55_v15 = vpop.permute.xlu1 %54 }
  0x81   :  { %vm56_vm2 = vcmp.eq.s32.totalorder %v24_v14, %v55_v15 }
  0x82   :  { %v57_v17 = vsel %vm56_vm2, 0.9, %v141_v16 }
  0x83   :  { %v58_v18 = vmul.f32 %v57_v17, %v20_v0 }
  0x85   :  { %v60_v21 = vsel %vm28_vm0, %v58_v18, 0.0 }
  0x8c   :  { %v31_v7 = vpop.xlane.xlu0 %30 }
  0x8d   :  { %v32_v8 = vmax.f32 %v27_v6, %v31_v7 }
  0x8f   :  { %v42_v9 = vsub.f32 %v27_v6, %v32_v8  ;;  %52 = vst.msk [vmem:[#allocation2] sm:$0xff] %vm16_vm1, %v32_v8  ;;  %35 = vperm.xlu0 %108, %v32_v8  }
  0x91   :  { %v43_v22 = vmul.f32 1.442695, %v42_v9 }
  0x96   :  { %v68_v34 = vld [vmem:[#allocation2] sm:$0xff] }
 0x10a   :  { %v36_v10 = vpop.permute.xlu0 %35 }
 0x10b   :  { %v38_v11 = vsub.f32 %v20_v0, %v36_v10 }
 0x10d   :  { %v39_v12 = vmul.f32 1.442695, %v38_v11 }
 0x10f   :  { %110 = vpow2.f32 %v39_v12 }
 0x110   :  { %112 = vpow2.f32 %v43_v22 }
 0x11c   :  { %v111_v19 = vpop.eup %110 }
 0x11d   :  { %v46_v20 = vsel %vm28_vm0, %v111_v19, 0.0  ;;  %v113_v23 = vpop.eup %112 }
 0x11e   :  { %47 = vadd.xlane.f32.xlu1 %v46_v20  ;;  %v45_v25 = vmul.f32 %v113_v23, %v41_v24 }
 0x122   :  { %61 = vadd.xlane.f32.xlu1 %v60_v21 }
 0x1a7   :  { %v48_v26 = vpop.xlane.xlu1 %47 }
 0x1a8   :  { %v49_v27 = vadd.f32 %v48_v26, %v45_v25 }
 0x1aa   :  { %51 = vst.msk [vmem:[#allocation3] sm:$0xff] %vm16_vm1, %v49_v27 }
 0x1ab   :  { %v62_v29 = vpop.xlane.xlu1 %61 }
 0x1ac   :  { %v63_v30 = vadd.f32 %v62_v29, %v59_v28 }
 0x1ae   :  { %64 = vst.msk [vmem:[#allocation4] sm:$0xff] %vm16_vm1, %v63_v30 }
 0x1b1   :  { %v69_v31 = vld [vmem:[#allocation3] sm:$0xff] }
 0x1b2   :  { %114 = vlog2.f32 %v69_v31 }
 0x1b5   :  { %v73_v35 = vld [vmem:[#allocation4] sm:$0xff] }
 0x1bf   :  { %v115_v32 = vpop.eup %114 }
 0x1c0   :  { %v71_v33 = vmul.f32 0.6931472, %v115_v32 }
 0x1c2   :  { %v72_v36 = vadd.f32 %v71_v33, %v68_v34 }
 0x1c4   :  { %v74_v37 = vsub.f32 %v72_v36, %v73_v35 }
 0x1c6   :  { %v75_v38 = vsel %vm16_vm1, %v74_v37, 0.0 }
 0x1c7   :  { %76 = vadd.xlane.f32.xlu1 %v75_v38 }
 0x250   :  { %v77_v39 = vpop.xlane.xlu1 %76 }
 0x251   :  { %v78_v40 = vrot.slane %v77_v39, 4 }
 0x253   :  { %v79_v41 = vadd.f32 %v78_v40, %v77_v39 }
 0x255   :  { %v80_v42 = vrot.slane %v79_v41, 2 }
 0x257   :  { %v81_v43 = vadd.f32 %v80_v42, %v79_v41 }
 0x259   :  { %v82_v44 = vrot.slane %v81_v43, 1 }
 0x25b   :  { %v83_v45 = vadd.f32 %v82_v44, %v81_v43 }
 0x25d   :  { %101 = vpush %v83_v45 }
 0x28e   :  { %s102_s13 = spop %101 }
 0x28f   :  { %v85_v46 = vstv %s102_s13 }
 0x290   :  { %86 = vst [vmem:[#allocation5] sm:$0xff] %v85_v46 }
 0x291   :  { %127 = shalt.err (!%p124_p4)
}
 0x292   :  { %96 = dma.vmem_to_hbm [thread:$0]  %s94_s1, 128, %s179_s2, [#allocation6]  }
 0x293   :  { %136 = dma.done.wait [#allocation6], 128  }
 0x294   :  { %137 = vsyncadd [#allocation6], 4294967168 }
 0x295   :  { %100 = vsyncpa [#allocation6], 1 }

</bundles_post_ra>
